<compile_context>
chip_gen: v7x
topology: tpu7x:2x2x1
jax: 0.10.0
libtpu: 0.0.40
codegen_flags: <defaults>
</compile_context>

<pallas_src>
import jax
import jax.numpy as jnp
from jax import lax
from jax.experimental import pallas as pl
from jax.experimental.pallas import tpu as pltpu

# Cell.__init__ defaults: bw_w=8, bw_b=8, bw_f=8
BW_W, BW_B, BW_F = 8, 8, 8
BN_EPS = 1e-5


def _quant(x, bw):
    """Per-tensor symmetric uniform quantization -> (integer codes as f32, scale)."""
    qmax = 2.0 ** (bw - 1) - 1.0
    scale = jnp.maximum(jnp.max(jnp.abs(x)) / qmax, 1e-12)
    inv = 1.0 / scale                                    # single scalar divide
    codes = jnp.clip(jnp.round(x * inv), -(qmax + 1.0), qmax)
    return codes, scale


def _fake_quant(x, bw):
    codes, scale = _quant(x, bw)
    return codes * scale


def cell_kernel(x_ref, m_ref, w1_ref, a1_ref, b1_ref, w2_ref, a2_ref, b2_ref, o_ref):
    # x_ref : (4, LANES)  f32 packed input: column n*(L+2)+p == x_pad[n, :, p]
    # m_ref : (1, LANES)  f32 validity mask (1 where the column is a real output position)
    # w1_ref: (8, 12)     bf16 conv1 weight codes, column index = k*4 + c_in
    # a1_ref: (8, 1)      f32  bn_scale * w1_scale   (input act-scale applied in-kernel)
    # b1_ref: (8, 1)      f32  bn_scale * b1_q + bn_shift
    # w2_ref: (2, 24)     bf16 conv2 weight codes, column index = k*8 + c_in
    # a2_ref: (2, 1)      f32  w2_scale              (interm. act-scale applied in-kernel)
    # b2_ref: (2, 1)      f32  b2_q
    # o_ref : (2, LANES)  f32 packed output (wrapper extracts the valid columns)
    lanes = x_ref.shape[-1]
    mask = m_ref[...]

    # --- activation_post_process on the input (per-tensor symmetric fake-quant) ---
    qx, sx = _quant(x_ref[...], BW_F)

    # --- conv1 (+ folded BN): stack the 3 taps along sublanes -> one MXU matmul ---
    xk = jnp.concatenate(
        [qx,                                             # x_pad[:, p]
         pltpu.roll(qx, lanes - 1, 1),                   # x_pad[:, p+1]  (roll left by 1)
         pltpu.roll(qx, lanes - 2, 1)],                  # x_pad[:, p+2]  (roll left by 2)
        axis=0).astype(jnp.bfloat16)                     # (12, LANES) integer codes
    y_raw = jnp.dot(w1_ref[...], xk,
                    preferred_element_type=jnp.float32)  # exact integer accumulation
    y = (a1_ref[...] * sx) * y_raw + b1_ref[...]
    y = y * mask                                         # zero pad / cross-batch columns

    # --- fake-quant of the ConvBn1d block output (per-tensor) ---
    qy, sy = _quant(y, BW_F)

    # --- conv2: halos via lane rolls of the in-register result -> one MXU matmul ---
    yk = jnp.concatenate(
        [pltpu.roll(qy, 1, 1),                           # y[:, l-1] (left halo, masked->0)
         qy,                                             # y[:, l]
         pltpu.roll(qy, lanes - 1, 1)],                  # y[:, l+1] (right halo, masked->0)
        axis=0).astype(jnp.bfloat16)                     # (24, LANES) integer codes
    z_raw = jnp.dot(w2_ref[...], yk,
                    preferred_element_type=jnp.float32)
    z = (a2_ref[...] * sy) * z_raw + b2_ref[...]
    z = z * mask

    # --- output fake-quant; single lane-dense store, no read-modify-write pass ---
    qz, sz = _quant(z, BW_F)
    o_ref[...] = qz * sz


@jax.jit
def cell_forward(x, params):
    """x: (N, 4, L) float32 in NCL layout (same channel-first convention as PyTorch)."""
    N, C, L = x.shape
    W = L + 2                                            # per-batch chunk width (pad=1 each side)
    lanes = max(128, ((N * W + 127) // 128) * 128)       # lane-dense, multiple of 128

    # ---- lane-dense packing: (N, C, L) -> zero-pad -> (C, N*W) -> pad to `lanes` ----
    x_pad = jnp.pad(x, ((0, 0), (0, 0), (1, 1)))
    x_packed = jnp.transpose(x_pad, (1, 0, 2)).reshape(C, N * W)
    x_packed = jnp.pad(x_packed, ((0, 0), (0, lanes - N * W)))

    # column n*W + p is a real conv-output position iff p < L (and within N*W)
    col = jnp.arange(lanes)
    mask = ((col % W < L) & (col < N * W)).astype(jnp.float32).reshape(1, lanes)

    # ---- hoisted constants: weight/bias fake-quant + eval-mode BN fold (after quant) ----
    qw1, sw1 = _quant(params["w1"], BW_W)                # (8,4,3) codes, scalar scale
    qw2, sw2 = _quant(params["w2"], BW_W)                # (2,8,3)
    b1q = _fake_quant(params["b1"], BW_B)                # (8,1)
    b2q = _fake_quant(params["b2"], BW_B)                # (2,1)
    bn_scale = params["gamma"] / jnp.sqrt(params["var"] + BN_EPS)   # (8,1)
    bn_shift = params["beta"] - params["mean"] * bn_scale           # (8,1)

    # (C_out, C_in, K) -> (C_out, K*C_in) with k-major columns to match the sublane stack
    w1m = jnp.transpose(qw1, (0, 2, 1)).reshape(8, 3 * 4).astype(jnp.bfloat16)
    w2m = jnp.transpose(qw2, (0, 2, 1)).reshape(2, 3 * 8).astype(jnp.bfloat16)
    alpha1 = bn_scale * sw1                              # (8,1)
    beta1 = bn_scale * b1q + bn_shift                    # (8,1)
    alpha2 = jnp.full((2, 1), sw2, jnp.float32)          # (2,1)
    beta2 = b2q                                          # (2,1)

    vmem = pl.BlockSpec(memory_space=pltpu.MemorySpace.VMEM)
    out_packed = pl.pallas_call(
        cell_kernel,
        out_shape=jax.ShapeDtypeStruct((2, lanes), jnp.float32),
        in_specs=[vmem] * 8,
        out_specs=vmem,
    )(x_packed, mask, w1m, alpha1, beta1, w2m, alpha2, beta2)

    # unpack: (2, lanes) -> (N, 2, L)  (layout plumbing in the wrapper, lane-dense out_spec)
    out = out_packed[:, :N * W].reshape(2, N, W)[:, :, :L]
    return jnp.transpose(out, (1, 0, 2))


def ref_forward(x, params):
    """Pure-JAX f32 reference with identical quant/BN math (independent conv impl)."""
    xq = _fake_quant(x, BW_F)
    w1q = _fake_quant(params["w1"], BW_W)
    b1q = _fake_quant(params["b1"], BW_B)
    y = lax.conv_general_dilated(xq, w1q, (1,), ((1, 1),),
                                 dimension_numbers=('NCH', 'OIH', 'NCH'))
    y = y + b1q.reshape(1, -1, 1)
    scale = params["gamma"] / jnp.sqrt(params["var"] + BN_EPS)
    shift = params["beta"] - params["mean"] * scale
    y = y * scale.reshape(1, -1, 1) + shift.reshape(1, -1, 1)
    y = _fake_quant(y, BW_F)
    w2q = _fake_quant(params["w2"], BW_W)
    b2q = _fake_quant(params["b2"], BW_B)
    z = lax.conv_general_dilated(y, w2q, (1,), ((1, 1),),
                                 dimension_numbers=('NCH', 'OIH', 'NCH'))
    z = z + b2q.reshape(1, -1, 1)
    return _fake_quant(z, BW_F)


def make_params(key):
    ks = jax.random.split(key, 8)
    # PyTorch-style uniform(+-1/sqrt(fan_in*k)) init, deterministic
    lim1 = 1.0 / jnp.sqrt(4.0 * 3.0)
    lim2 = 1.0 / jnp.sqrt(8.0 * 3.0)
    return {
        "w1": jax.random.uniform(ks[0], (8, 4, 3), jnp.float32, -lim1, lim1),
        "b1": jax.random.uniform(ks[1], (8, 1), jnp.float32, -lim1, lim1),
        "gamma": jax.random.uniform(ks[2], (8, 1), jnp.float32, 0.8, 1.2),
        "beta": jax.random.uniform(ks[3], (8, 1), jnp.float32, -0.1, 0.1),
        "mean": jax.random.uniform(ks[4], (8, 1), jnp.float32, -0.2, 0.2),
        "var": jax.random.uniform(ks[5], (8, 1), jnp.float32, 0.5, 1.5),
        "w2": jax.random.uniform(ks[6], (2, 8, 3), jnp.float32, -lim2, lim2),
        "b2": jax.random.uniform(ks[7], (2, 1), jnp.float32, -lim2, lim2),
    }


if __name__ == "__main__":
    key = jax.random.PRNGKey(0)
    kx, kp = jax.random.split(key)
    N, C, L = 2, 4, 16
    x = jax.random.normal(kx, (N, C, L), jnp.float32)
    params = make_params(kp)

    out = jax.block_until_ready(cell_forward(x, params))
    ref = jax.block_until_ready(ref_forward(x, params))

    assert out.shape == (N, 2, L), out.shape
    assert bool(jnp.all(jnp.isfinite(out)))
    # integer-code matmuls are exact; generous atol only covers rare half-ulp quant flips
    err = float(jnp.max(jnp.abs(out - ref)))
    assert err < 5e-2, err
    print("KERNEL_OK")
</pallas_src>

<mosaic_0001>
module attributes {stable_mosaic.version = 11 : i64} {
  func.func @cell_kernel(%arg0: memref<4x128xf32, #tpu.memory_space<vmem>>, %arg1: memref<1x128xf32, #tpu.memory_space<vmem>>, %arg2: memref<8x12xbf16, #tpu.memory_space<vmem>>, %arg3: memref<8x1xf32, #tpu.memory_space<vmem>>, %arg4: memref<8x1xf32, #tpu.memory_space<vmem>>, %arg5: memref<2x24xbf16, #tpu.memory_space<vmem>>, %arg6: memref<2x1xf32, #tpu.memory_space<vmem>>, %arg7: memref<2x1xf32, #tpu.memory_space<vmem>>, %arg8: memref<2x128xf32, #tpu.memory_space<vmem>>) attributes {dimension_semantics = [], scalar_prefetch = 0 : i64, scratch_operands = 0 : i64, tpu.core_type = #tpu.core_type<tc>} {
    %c0 = arith.constant 0 : index
    %c0_0 = arith.constant 0 : index
    %0 = vector.load %arg1[%c0, %c0_0] : memref<1x128xf32, #tpu.memory_space<vmem>>, vector<1x128xf32>
    %c0_1 = arith.constant 0 : index
    %c0_2 = arith.constant 0 : index
    %1 = vector.load %arg0[%c0_1, %c0_2] : memref<4x128xf32, #tpu.memory_space<vmem>>, vector<4x128xf32>
    %2 = math.absf %1 : vector<4x128xf32>
    %3 = vector.shape_cast %2 : vector<4x128xf32> to vector<1x4x128xf32>
    %cst = arith.constant dense<0xFF800000> : vector<1xf32>
    %4 = vector.multi_reduction <maximumf>, %3, %cst [1, 2] : vector<1x4x128xf32> to vector<1xf32>
    %5 = vector.shape_cast %4 : vector<1xf32> to vector<1x1x1xf32>
    %6 = vector.extract %5[0, 0, 0] : f32 from vector<1x1x1xf32>
    %cst_3 = arith.constant 1.270000e+02 : f32
    %7 = arith.divf %6, %cst_3 : f32
    %cst_4 = arith.constant 9.99999996E-13 : f32
    %8 = arith.maximumf %7, %cst_4 : f32
    %cst_5 = arith.constant 1.000000e+00 : f32
    %9 = arith.divf %cst_5, %8 : f32
    %10 = vector.broadcast %9 : f32 to vector<4x128xf32>
    %11 = arith.mulf %1, %10 : vector<4x128xf32>
    %12 = math.roundeven %11 : vector<4x128xf32>
    %cst_6 = arith.constant -1.280000e+02 : f32
    %cst_7 = arith.constant 1.270000e+02 : f32
    %13 = vector.broadcast %cst_6 : f32 to vector<4x128xf32>
    %14 = arith.maximumf %13, %12 : vector<4x128xf32>
    %15 = vector.broadcast %cst_7 : f32 to vector<4x128xf32>
    %16 = arith.minimumf %15, %14 : vector<4x128xf32>
    %c127_i32 = arith.constant 127 : i32
    %17 = tpu.dynamic_rotate %16 by %c127_i32 dim 1 : vector<4x128xf32>, i32 -> vector<4x128xf32>
    %c126_i32 = arith.constant 126 : i32
    %18 = tpu.dynamic_rotate %16 by %c126_i32 dim 1 : vector<4x128xf32>, i32 -> vector<4x128xf32>
    %19 = tpu.concatenate %16, %17, %18 in 0 : vector<4x128xf32>, vector<4x128xf32>, vector<4x128xf32> -> vector<12x128xf32>
    %20 = arith.truncf %19 : vector<12x128xf32> to vector<12x128xbf16>
    %c0_8 = arith.constant 0 : index
    %c0_9 = arith.constant 0 : index
    %21 = vector.load %arg2[%c0_8, %c0_9] : memref<8x12xbf16, #tpu.memory_space<vmem>>, vector<8x12xbf16>
    %cst_10 = arith.constant dense<0.000000e+00> : vector<8x128xf32>
    %22 = tpu.matmul %21, %20, %cst_10 {dimension_numbers = #tpu.dot_dimension_numbers<[1], [0], [0], [1], [0, 0, 1, 1], [], []>} : vector<8x12xbf16>, vector<12x128xbf16>, vector<8x128xf32> -> vector<8x128xf32>
    %c0_11 = arith.constant 0 : index
    %c0_12 = arith.constant 0 : index
    %23 = vector.load %arg3[%c0_11, %c0_12] : memref<8x1xf32, #tpu.memory_space<vmem>>, vector<8x1xf32>
    %24 = vector.broadcast %8 : f32 to vector<8x1xf32>
    %25 = arith.mulf %23, %24 : vector<8x1xf32>
    %26 = vector.broadcast %25 : vector<8x1xf32> to vector<8x128xf32>
    %27 = arith.mulf %26, %22 : vector<8x128xf32>
    %c0_13 = arith.constant 0 : index
    %c0_14 = arith.constant 0 : index
    %28 = vector.load %arg4[%c0_13, %c0_14] : memref<8x1xf32, #tpu.memory_space<vmem>>, vector<8x1xf32>
    %29 = vector.broadcast %28 : vector<8x1xf32> to vector<8x128xf32>
    %30 = arith.addf %27, %29 : vector<8x128xf32>
    %31 = vector.broadcast %0 : vector<1x128xf32> to vector<8x128xf32>
    %32 = arith.mulf %30, %31 : vector<8x128xf32>
    %33 = math.absf %32 : vector<8x128xf32>
    %34 = vector.shape_cast %33 : vector<8x128xf32> to vector<1x8x128xf32>
    %cst_15 = arith.constant dense<0xFF800000> : vector<1xf32>
    %35 = vector.multi_reduction <maximumf>, %34, %cst_15 [1, 2] : vector<1x8x128xf32> to vector<1xf32>
    %36 = vector.shape_cast %35 : vector<1xf32> to vector<1x1x1xf32>
    %37 = vector.extract %36[0, 0, 0] : f32 from vector<1x1x1xf32>
    %cst_16 = arith.constant 1.270000e+02 : f32
    %38 = arith.divf %37, %cst_16 : f32
    %cst_17 = arith.constant 9.99999996E-13 : f32
    %39 = arith.maximumf %38, %cst_17 : f32
    %cst_18 = arith.constant 1.000000e+00 : f32
    %40 = arith.divf %cst_18, %39 : f32
    %41 = vector.broadcast %40 : f32 to vector<8x128xf32>
    %42 = arith.mulf %32, %41 : vector<8x128xf32>
    %43 = math.roundeven %42 : vector<8x128xf32>
    %cst_19 = arith.constant -1.280000e+02 : f32
    %cst_20 = arith.constant 1.270000e+02 : f32
    %44 = vector.broadcast %cst_19 : f32 to vector<8x128xf32>
    %45 = arith.maximumf %44, %43 : vector<8x128xf32>
    %46 = vector.broadcast %cst_20 : f32 to vector<8x128xf32>
    %47 = arith.minimumf %46, %45 : vector<8x128xf32>
    %c1_i32 = arith.constant 1 : i32
    %48 = tpu.dynamic_rotate %47 by %c1_i32 dim 1 : vector<8x128xf32>, i32 -> vector<8x128xf32>
    %c127_i32_21 = arith.constant 127 : i32
    %49 = tpu.dynamic_rotate %47 by %c127_i32_21 dim 1 : vector<8x128xf32>, i32 -> vector<8x128xf32>
    %50 = tpu.concatenate %48, %47, %49 in 0 : vector<8x128xf32>, vector<8x128xf32>, vector<8x128xf32> -> vector<24x128xf32>
    %51 = arith.truncf %50 : vector<24x128xf32> to vector<24x128xbf16>
    %c0_22 = arith.constant 0 : index
    %c0_23 = arith.constant 0 : index
    %52 = vector.load %arg5[%c0_22, %c0_23] : memref<2x24xbf16, #tpu.memory_space<vmem>>, vector<2x24xbf16>
    %cst_24 = arith.constant dense<0.000000e+00> : vector<2x128xf32>
    %53 = tpu.matmul %52, %51, %cst_24 {dimension_numbers = #tpu.dot_dimension_numbers<[1], [0], [0], [1], [0, 0, 1, 1], [], []>} : vector<2x24xbf16>, vector<24x128xbf16>, vector<2x128xf32> -> vector<2x128xf32>
    %c0_25 = arith.constant 0 : index
    %c0_26 = arith.constant 0 : index
    %54 = vector.load %arg6[%c0_25, %c0_26] : memref<2x1xf32, #tpu.memory_space<vmem>>, vector<2x1xf32>
    %55 = vector.broadcast %39 : f32 to vector<2x1xf32>
    %56 = arith.mulf %54, %55 : vector<2x1xf32>
    %57 = vector.broadcast %56 : vector<2x1xf32> to vector<2x128xf32>
    %58 = arith.mulf %57, %53 : vector<2x128xf32>
    %c0_27 = arith.constant 0 : index
    %c0_28 = arith.constant 0 : index
    %59 = vector.load %arg7[%c0_27, %c0_28] : memref<2x1xf32, #tpu.memory_space<vmem>>, vector<2x1xf32>
    %60 = vector.broadcast %59 : vector<2x1xf32> to vector<2x128xf32>
    %61 = arith.addf %58, %60 : vector<2x128xf32>
    %62 = vector.broadcast %0 : vector<1x128xf32> to vector<2x128xf32>
    %63 = arith.mulf %61, %62 : vector<2x128xf32>
    %64 = math.absf %63 : vector<2x128xf32>
    %65 = vector.shape_cast %64 : vector<2x128xf32> to vector<1x2x128xf32>
    %cst_29 = arith.constant dense<0xFF800000> : vector<1xf32>
    %66 = vector.multi_reduction <maximumf>, %65, %cst_29 [1, 2] : vector<1x2x128xf32> to vector<1xf32>
    %67 = vector.shape_cast %66 : vector<1xf32> to vector<1x1x1xf32>
    %68 = vector.extract %67[0, 0, 0] : f32 from vector<1x1x1xf32>
    %cst_30 = arith.constant 1.270000e+02 : f32
    %69 = arith.divf %68, %cst_30 : f32
    %cst_31 = arith.constant 9.99999996E-13 : f32
    %70 = arith.maximumf %69, %cst_31 : f32
    %cst_32 = arith.constant 1.000000e+00 : f32
    %71 = arith.divf %cst_32, %70 : f32
    %72 = vector.broadcast %71 : f32 to vector<2x128xf32>
    %73 = arith.mulf %63, %72 : vector<2x128xf32>
    %74 = math.roundeven %73 : vector<2x128xf32>
    %cst_33 = arith.constant -1.280000e+02 : f32
    %cst_34 = arith.constant 1.270000e+02 : f32
    %75 = vector.broadcast %cst_33 : f32 to vector<2x128xf32>
    %76 = arith.maximumf %75, %74 : vector<2x128xf32>
    %77 = vector.broadcast %cst_34 : f32 to vector<2x128xf32>
    %78 = arith.minimumf %77, %76 : vector<2x128xf32>
    %79 = vector.broadcast %70 : f32 to vector<2x128xf32>
    %80 = arith.mulf %78, %79 : vector<2x128xf32>
    %c0_35 = arith.constant 0 : index
    %c0_36 = arith.constant 0 : index
    %81 = vector.load %arg8[%c0_35, %c0_36] : memref<2x128xf32, #tpu.memory_space<vmem>>, vector<2x128xf32>
    tpu.vector_store %arg8[%c0_35, %c0_36], %80 {strides = array<i32>} : memref<2x128xf32, #tpu.memory_space<vmem>>, vector<2x128xf32>,
    return
  }
}

</mosaic_0001>

<bundles_post_ra>
// kernel: cell_forward.1
= control target key start
LH: loop header
LB: loop body
LE: loop exit
PB: predicated region body
PF: predicated region fallthrough
CT: control target
= control target key end

     0   :  { %vm33_vm0 = vcmask 1043456   ;;  %v313_v9 = vmov 0   ;;  %s314_s9 = smov 1e-12   ;;  %v315_v13 = vmov 0.0   ;;  %vm316_vm1 = vmmov 0   ;;  %s405_s0 = inlined_call_operand.vmem [shape: f32[4,128], index: 0, kind: input, shape index: {}]   ;;  %s406_s3 = inlined_call_operand.vmem [shape: f32[8,1], index: 3, kind: input, shape index: {}]   ;;  %s407_s4 = inlined_call_operand.vmem [shape: f32[8,1], index: 4, kind: input, shape index: {}]   ;;  %s408_s2 = inlined_call_operand.vmem [shape: bf16[8,12], index: 2, kind: input, shape index: {}]   ;;  %s409_s1 = inlined_call_operand.vmem [shape: f32[1,128], index: 1, kind: input, shape index: {}]   ;;  %s410_s6 = inlined_call_operand.vmem [shape: f32[2,1], index: 6, kind: input, shape index: {}]   ;;  %s411_s7 = inlined_call_operand.vmem [shape: f32[2,1], index: 7, kind: input, shape index: {}]   ;;  %s412_s5 = inlined_call_operand.vmem [shape: bf16[2,24], index: 5, kind: input, shape index: {}]   ;;  %s413_s8 = inlined_call_operand.vmem [shape: f32[2,128], index: 8, kind: output, shape index: {}]  }
   0x1   :  { %v31_v0 = vld [vmem:[%s405_s0] sm:$0xf]  ;;  %305 = vset.pattern.permute.xlu1 %v313_v9  ;;  %306 = vset.pattern.permute.xlu0 %v313_v9  ;;  %s317_s13 = smov 126   ;;  %s318_s14 = smov 127   ;;  %vm70_vm2 = vcmask 1045504   ;;  %vm66_vm3 = vcmask 97280  }
   0x2   :  { %v32_v1 = vand.u32 2147483647, %v31_v0  ;;  %269 = vmatprep.subr.bf16.mxu0 %v315_v13  ;;  %275 = vmatprep.subr.bf16.mxu1 %v315_v13  ;;  %v114_v19 = vld [vmem:[%s406_s3] sm:$0xff]  ;;  %s319_s21 = smov 1   ;;  %vm166_vm4 = vcmask 195584   ;;  %vm231_vm5 = vcmask 1041408  }
   0x3   :  { %271 = vmatprep.mubr.msk.bf16.mxu0 %vm316_vm1, %v315_v13  ;;  %279 = vmatprep.mubr.msk.bf16.mxu1 %vm316_vm1, %v315_v13  ;;  %v123_v21 = vld [vmem:[%s407_s4] sm:$0xff] }
   0x4   :  { %v34_v2 = vsel %vm33_vm0, %v32_v1, -inf  ;;  %v65_v28 = vld [vmem:[%s408_s2] sm:$0xf] }
   0x5   :  { %35 = vmax.xlane.f32.xlu0 %v34_v2  ;;  %v262_v35 = vld [vmem:[%s409_s1] ss:$0 sm:$0xff] }
   0x6   :  { %v213_v54 = vld [vmem:[%s410_s6] sm:$0x3] }
   0x7   :  { %v222_v56 = vld [vmem:[%s411_s7] sm:$0x3] }
   0x8   :  { %v165_v62 = vld [vmem:[%s412_s5] sm:$0x1] }
  0x92   :  { %v36_v3 = vpop.xlane.xlu0 %35 }
  0x93   :  { %v37_v4 = vrot.slane %v36_v3, 4 }
  0x95   :  { %v38_v5 = vmax.f32 %v36_v3, %v37_v4 }
  0x97   :  { %v39_v6 = vrot.slane %v38_v5, 2 }
  0x99   :  { %v40_v7 = vmax.f32 %v38_v5, %v39_v6 }
  0x9b   :  { %v41_v8 = vrot.slane %v40_v7, 1 }
  0x9d   :  { %v42_v10 = vmax.f32 %v40_v7, %v41_v8 }
  0x9f   :  { %283 = vpush %v42_v10 }
  0xd0   :  { %s284_s29 = spop %283 }
  0xd1   :  { %s46_s30 = smul.f32 0.007874016, %s284_s29 }
  0xd3   :  { %s47_s0 = smax.f32 %s314_s9, %s46_s30 }
  0xd4   :  { %v48_v11 = vstv %s47_s0 }
  0xd5   :  { %307 = vrcp.f32 %v48_v11  ;;  %v116_v20 = vmul.f32 %v114_v19, %v48_v11 }
  0xdf   :  { %v308_v12 = vpop.eup %307 }
  0xe0   :  { %285 = vpush %v308_v12 }
 0x111   :  { %s286_s10 = spop %285 }
 0x112   :  { %v51_v14 = vstv %s286_s10 }
 0x113   :  { %v52_v15 = vmul.f32 %v51_v14, %v31_v0 }
 0x115   :  { %v287_v16 = vround.rtne.f32 %v52_v15 }
 0x117   :  { %v54_v17 = vmax.f32 %v287_v16, -128.0 }
 0x119   :  { %v55_v18 = vmin.f32 %v54_v17, 127.0 }
 0x11b   :  { %58 = vrot.lane.b32.xlu1 %v55_v18, %s317_s13  ;;  %56 = vrot.lane.b32.xlu0 %v55_v18, %s318_s14 }
 0x11f   :  { %119 = vperm.xlu1 %305, %v116_v20  }
 0x123   :  { %126 = vperm.xlu1 %305, %v123_v21  }
 0x18d   :  { %v57_v22 = vpop.permute.xlu0 %56  ;;  %v59_v24 = vpop.permute.xlu1 %58 }
 0x18e   :  { %v61_v23 = vrot.slane %v57_v22, 4 }
 0x190   :  { %v63_v25 = vsel %vm33_vm0, %v55_v18, %v61_v23 }
 0x191   :  { %v64_v26 = vpack.c.bf16 %v59_v24, %v63_v25 }
 0x193   :  { %v72_v27 = vsel %vm70_vm2, %v64_v26, 0 }
 0x194   :  { %270 = vmatpush3.bf16.msra.mxu0 %v72_v27 }
 0x197   :  { %272 = vmatmul.mubr.msk.bf16.vlgmr.msra.gmra.mrb[0].mxu0 %vm66_vm3, %v65_v28 }
 0x19e   :  { %v120_v29 = vpop.permute.xlu1 %119 }
 0x1a2   :  { %v127_v33 = vpop.permute.xlu1 %126 }
 0x26a   :  { %v108_v30 = vpop.f32.mrb[0].mxu0 }
 0x26b   :  { %v122_v31 = vmul.f32 %v120_v29, %v108_v30  ;;  %v273_v32 = vpop.f32.mrb[1].mxu0 }
 0x26c   :  { %v111_v34 = vpop.f32.mrb[2].mxu0 }
 0x26d   :  { %v129_v36 = vadd.f32 %v127_v33, %v122_v31  ;;  %v274_v37 = vpop.f32.mrb[3].mxu0 }
 0x26f   :  { %v136_v38 = vmul.f32 %v262_v35, %v129_v36 }
 0x271   :  { %v137_v39 = vand.u32 2147483647, %v136_v38 }
 0x273   :  { %138 = vmax.xlane.f32.xlu1 %v137_v39 }
 0x300   :  { %v139_v40 = vpop.xlane.xlu1 %138 }
 0x301   :  { %v140_v41 = vrot.slane %v139_v40, 4 }
 0x303   :  { %v141_v42 = vmax.f32 %v139_v40, %v140_v41 }
 0x305   :  { %v142_v43 = vrot.slane %v141_v42, 2 }
 0x307   :  { %v143_v44 = vmax.f32 %v141_v42, %v142_v43 }
 0x309   :  { %v144_v45 = vrot.slane %v143_v44, 1 }
 0x30b   :  { %v145_v46 = vmax.f32 %v143_v44, %v144_v45 }
 0x30d   :  { %288 = vpush %v145_v46 }
 0x33e   :  { %s289_s2 = spop %288 }
 0x33f   :  { %s149_s19 = smul.f32 0.007874016, %s289_s2 }
 0x341   :  { %s150_s20 = smax.f32 %s314_s9, %s149_s19 }
 0x342   :  { %v151_v47 = vstv %s150_s20 }
 0x343   :  { %309 = vrcp.f32 %v151_v47  ;;  %v215_v55 = vmul.f32 %v213_v54, %v151_v47 }
 0x34d   :  { %v310_v48 = vpop.eup %309 }
 0x34e   :  { %290 = vpush %v310_v48 }
 0x37f   :  { %s291_s1 = spop %290 }
 0x380   :  { %v154_v49 = vstv %s291_s1 }
 0x381   :  { %v155_v50 = vmul.f32 %v154_v49, %v136_v38 }
 0x383   :  { %v292_v51 = vround.rtne.f32 %v155_v50 }
 0x385   :  { %v157_v52 = vmax.f32 %v292_v51, -128.0 }
 0x387   :  { %v158_v53 = vmin.f32 %v157_v52, 127.0 }
 0x389   :  { %159 = vrot.lane.b32.xlu0 %v158_v53, %s319_s21 }
 0x38d   :  { %161 = vrot.lane.b32.xlu0 %v158_v53, %s318_s14 }
 0x391   :  { %218 = vperm.xlu0 %306, %v215_v55  }
 0x395   :  { %225 = vperm.xlu0 %306, %v222_v56  }
 0x3fb   :  { %v160_v57 = vpop.permute.xlu0 %159 }
 0x3fc   :  { %v163_v58 = vpack.c.bf16 %v158_v53, %v160_v57 }
 0x3fe   :  { %276 = vmatpush3.bf16.msra.mxu1 %v163_v58 }
 0x3ff   :  { %v162_v59 = vpop.permute.xlu0 %161  ;;  %277 = vmatprep.subr.bf16.mxu1 %v315_v13 }
 0x400   :  { %v164_v60 = vpack.c.bf16 %v162_v59, %v162_v59 }
 0x402   :  { %v171_v61 = vsel %vm33_vm0, %v164_v60, 0 }
 0x403   :  { %278 = vmatpush3.bf16.msra.mxu1 %v171_v61 }
 0x406   :  { %280 = vmatmul.mubr.msk.bf16.vlgmr.msra.gmra.mrb[0].mxu1 %vm166_vm4, %v165_v62 }
 0x410   :  { %v219_v63 = vpop.permute.xlu0 %218 }
 0x414   :  { %v226_v3 = vpop.permute.xlu0 %225 }
 0x4d9   :  { %v207_v0 = vpop.f32.mrb[0].mxu1 }
 0x4da   :  { %v221_v1 = vmul.f32 %v219_v63, %v207_v0  ;;  %v281_v2 = vpop.f32.mrb[1].mxu1 }
 0x4db   :  { %v210_v4 = vpop.f32.mrb[2].mxu1 }
 0x4dc   :  { %v228_v5 = vadd.f32 %v226_v3, %v221_v1  ;;  %v282_v6 = vpop.f32.mrb[3].mxu1 }
 0x4de   :  { %v229_v7 = vmul.f32 %v262_v35, %v228_v5 }
 0x4e0   :  { %v230_v8 = vand.u32 2147483647, %v229_v7 }
 0x4e2   :  { %v232_v9 = vsel %vm231_vm5, %v230_v8, -inf }
 0x4e3   :  { %233 = vmax.xlane.f32.xlu0 %v232_v9 }
 0x570   :  { %v234_v10 = vpop.xlane.xlu0 %233 }
 0x571   :  { %v235_v11 = vrot.slane %v234_v10, 4 }
 0x573   :  { %v236_v12 = vmax.f32 %v234_v10, %v235_v11 }
 0x575   :  { %v237_v13 = vrot.slane %v236_v12, 2 }
 0x577   :  { %v238_v14 = vmax.f32 %v236_v12, %v237_v13 }
 0x579   :  { %v239_v15 = vrot.slane %v238_v14, 1 }
 0x57b   :  { %v240_v16 = vmax.f32 %v238_v14, %v239_v15 }
 0x57d   :  { %293 = vpush %v240_v16 }
 0x5ae   :  { %s294_s5 = spop %293 }
 0x5af   :  { %s244_s7 = smul.f32 0.007874016, %s294_s5 }
 0x5b1   :  { %s245_s27 = smax.f32 %s314_s9, %s244_s7 }
 0x5b2   :  { %v246_v17 = vstv %s245_s27 }
 0x5b3   :  { %311 = vrcp.f32 %v246_v17 }
 0x5bd   :  { %v312_v18 = vpop.eup %311 }
 0x5be   :  { %295 = vpush %v312_v18 }
 0x5ef   :  { %s296_s28 = spop %295 }
 0x5f0   :  { %v249_v19 = vstv %s296_s28 }
 0x5f1   :  { %v250_v20 = vmul.f32 %v249_v19, %v229_v7 }
 0x5f3   :  { %v297_v21 = vround.rtne.f32 %v250_v20 }
 0x5f5   :  { %v252_v22 = vmax.f32 %v297_v21, -128.0 }
 0x5f7   :  { %v253_v23 = vmin.f32 %v252_v22, 127.0 }
 0x5f9   :  { %v255_v24 = vmul.f32 %v253_v23, %v246_v17 }
 0x5fb   :  { %256 = vst [vmem:[%s413_s8] sm:$0x3] %v255_v24 }

</bundles_post_ra>
